<compile_context>
chip_gen: v7x
topology: tpu7x:2x2x1
jax: 0.10.0
libtpu: 0.0.40
codegen_flags: <defaults>
</compile_context>

<pallas_src>
import jax
import jax.numpy as jnp
from jax.experimental import pallas as pl
from jax.experimental.pallas import tpu as pltpu


def _gmm_logprob_kernel(x_ref, a_ref, b_ref, const_ref, out_ref):
    """x_ref [D, TN], a_ref [K*D, D] (=-P/2 stacked), b_ref [K, D] (=P mu),
    const_ref (K,) in SMEM, out_ref [1, TN]."""
    x = x_ref[...].astype(jnp.float32)                         # [D, TN]
    a = a_ref[...]                                             # [K*D, D]
    b = b_ref[...]                                             # [K, D]
    K, D = b.shape

    # One fused MXU push for all K quadratic terms, one for all linear terms.
    z = jnp.dot(a, x, preferred_element_type=jnp.float32)      # [K*D, TN]
    lin = jnp.dot(b, x, preferred_element_type=jnp.float32)    # [K,   TN]

    logits = []
    for k in range(K):                                         # K static & small
        zk = z[k * D:(k + 1) * D, :]                           # [D, TN]
        quad = jnp.sum(x * zk, axis=0, keepdims=True)          # [1, TN]
        logits.append(const_ref[k] + lin[k:k + 1, :] + quad)   # [1, TN]

    # Numerically stable logsumexp over the K components (all [1, TN] rows).
    m = logits[0]
    for k in range(1, K):
        m = jnp.maximum(m, logits[k])
    s = jnp.exp(logits[0] - m)
    for k in range(1, K):
        s = s + jnp.exp(logits[k] - m)
    out_ref[...] = m + jnp.log(s)                              # [1, TN]


def _round_up(n, m):
    return ((n + m - 1) // m) * m


def gaussian_mixture_log_prob(x, weights, means, covs, *, tile_n=2048):
    """Equivalent of GaussianMixture.forward(x) for x of shape [N, D]."""
    N, D = x.shape
    K = weights.shape[0]

    # ---- plain-JAX parameter preprocessing (Cholesky-based; K x D x D is tiny)
    probs = weights.astype(jnp.float32) / jnp.sum(weights.astype(jnp.float32))
    covs_f = covs.astype(jnp.float32)
    means_f = means.astype(jnp.float32)
    chol = jnp.linalg.cholesky(covs_f)                               # [K, D, D]
    logdet = 2.0 * jnp.sum(
        jnp.log(jnp.diagonal(chol, axis1=-2, axis2=-1)), axis=-1)    # [K]
    eye = jnp.eye(D, dtype=jnp.float32)
    prec = jax.vmap(lambda L: jax.scipy.linalg.cho_solve((L, True), eye))(chol)

    a_all = (-0.5 * prec).reshape(K * D, D)                          # -P/2 stacked
    b_lin = jnp.einsum("kde,ke->kd", prec, means_f)                  # P mu
    const = (jnp.log(probs)
             - 0.5 * (D * jnp.log(2.0 * jnp.pi) + logdet)
             - 0.5 * jnp.sum(means_f * b_lin, axis=-1)).astype(jnp.float32)

    # ---- lane-dense layout: samples on the lane axis, padded to the tile
    n128 = _round_up(N, 128)
    tile = min(tile_n, n128)
    n_pad = _round_up(N, tile)
    x_t = jnp.pad(x.T, ((0, 0), (0, n_pad - N)))                     # [D, n_pad]

    grid = (n_pad // tile,)
    out = pl.pallas_call(
        _gmm_logprob_kernel,
        out_shape=jax.ShapeDtypeStruct((1, n_pad), jnp.float32),
        grid=grid,
        in_specs=[
            pl.BlockSpec((D, tile), lambda i: (0, i)),               # x tile
            pl.BlockSpec((K * D, D), lambda i: (0, 0)),              # -P/2 stacked
            pl.BlockSpec((K, D), lambda i: (0, 0)),                  # P mu
            pl.BlockSpec(memory_space=pltpu.MemorySpace.SMEM),       # const (K,)
        ],
        out_specs=pl.BlockSpec((1, tile), lambda i: (0, i)),
        compiler_params=pltpu.CompilerParams(
            dimension_semantics=("parallel",)),
    )(x_t, a_all, b_lin, const)
    return out[0, :N]                                                # [N]


if __name__ == "__main__":
    n_components = 3
    n_features = 8
    n_samples = 256

    key = jax.random.PRNGKey(0)
    k_means, k_x = jax.random.split(key)

    # Deterministic parameter init mirroring the module's __init__:
    weights = jnp.ones((n_components,), jnp.float32) / n_components
    means = jax.random.normal(k_means, (n_components, n_features), jnp.float32)
    covs = jnp.stack([jnp.eye(n_features, dtype=jnp.float32)] * n_components)

    x = jax.random.normal(k_x, (n_samples, n_features), jnp.float32)

    out = gaussian_mixture_log_prob(x, weights, means, covs)
    out = jax.block_until_ready(out)

    # Pure-JAX reference (Mahalanobis form) for the same math.
    probs = weights / jnp.sum(weights)
    ref_logits = []
    for k in range(n_components):
        diff = x - means[k]
        pk = jnp.linalg.inv(covs[k])
        quad = jnp.einsum("nd,de,ne->n", diff, pk, diff)
        _, ld = jnp.linalg.slogdet(covs[k])
        ref_logits.append(jnp.log(probs[k])
                          - 0.5 * (n_features * jnp.log(2.0 * jnp.pi) + ld + quad))
    ref = jax.scipy.special.logsumexp(jnp.stack(ref_logits, 0), axis=0)

    assert out.shape == (n_samples,)
    max_err = float(jnp.max(jnp.abs(out - ref)))
    assert jnp.allclose(out, ref, atol=1e-3, rtol=1e-4), max_err
    print("KERNEL_OK")
</pallas_src>

<mosaic_0001>
module attributes {stable_mosaic.version = 11 : i64} {
  func.func @_gmm_logprob_kernel(%arg0: i32, %arg1: memref<8x256xf32, #tpu.memory_space<vmem>>, %arg2: memref<24x8xf32, #tpu.memory_space<vmem>>, %arg3: memref<3x8xf32, #tpu.memory_space<vmem>>, %arg4: memref<3xf32, #tpu.memory_space<smem>>, %arg5: memref<1x256xf32, #tpu.memory_space<vmem>>) attributes {dimension_semantics = [#tpu.dimension_semantics<parallel>], iteration_bounds = array<i64: 1>, scalar_prefetch = 0 : i64, scratch_operands = 0 : i64, tpu.core_type = #tpu.core_type<tc>, window_params = [{transform_indices = @transform_0, window_bounds = array<i64: 8, 256>}, {pipeline_mode = #tpu.pipeline_mode<synchronous>, transform_indices = @transform_1, window_bounds = array<i64: 24, 8>}, {pipeline_mode = #tpu.pipeline_mode<synchronous>, transform_indices = @transform_2, window_bounds = array<i64: 3, 8>}, {transform_indices = @transform_3, window_bounds = array<i64: 3>}, {transform_indices = @transform_4, window_bounds = array<i64: 1, 256>}]} {
    %c0 = arith.constant 0 : index
    %c0_0 = arith.constant 0 : index
    %0 = vector.load %arg1[%c0, %c0_0] : memref<8x256xf32, #tpu.memory_space<vmem>>, vector<8x256xf32>
    %c0_1 = arith.constant 0 : index
    %c0_2 = arith.constant 0 : index
    %1 = vector.load %arg2[%c0_1, %c0_2] : memref<24x8xf32, #tpu.memory_space<vmem>>, vector<24x8xf32>
    %c0_3 = arith.constant 0 : index
    %c0_4 = arith.constant 0 : index
    %2 = vector.load %arg3[%c0_3, %c0_4] : memref<3x8xf32, #tpu.memory_space<vmem>>, vector<3x8xf32>
    %cst = arith.constant dense<0.000000e+00> : vector<24x256xf32>
    %3 = tpu.matmul %1, %0, %cst {dimension_numbers = #tpu.dot_dimension_numbers<[1], [0], [0], [1], [0, 0, 1, 1], [], []>} : vector<24x8xf32>, vector<8x256xf32>, vector<24x256xf32> -> vector<24x256xf32>
    %cst_5 = arith.constant dense<0.000000e+00> : vector<3x256xf32>
    %4 = tpu.matmul %2, %0, %cst_5 {dimension_numbers = #tpu.dot_dimension_numbers<[1], [0], [0], [1], [0, 0, 1, 1], [], []>} : vector<3x8xf32>, vector<8x256xf32>, vector<3x256xf32> -> vector<3x256xf32>
    %5 = vector.extract_strided_slice %3 {offsets = [0, 0], sizes = [8, 256], strides = [1, 1]} : vector<24x256xf32> to vector<8x256xf32>
    %6 = arith.mulf %0, %5 : vector<8x256xf32>
    %cst_6 = arith.constant dense<0.000000e+00> : vector<256xf32>
    %7 = vector.multi_reduction <add>, %6, %cst_6 [0] : vector<8x256xf32> to vector<256xf32>
    %8 = vector.shape_cast %7 : vector<256xf32> to vector<1x256xf32>
    %c0_7 = arith.constant 0 : index
    %9 = memref.load %arg4[%c0_7] : memref<3xf32, #tpu.memory_space<smem>>
    %10 = vector.extract_strided_slice %4 {offsets = [0, 0], sizes = [1, 256], strides = [1, 1]} : vector<3x256xf32> to vector<1x256xf32>
    %11 = vector.broadcast %9 : f32 to vector<1x256xf32>
    %12 = arith.addf %11, %10 : vector<1x256xf32>
    %13 = arith.addf %12, %8 : vector<1x256xf32>
    %14 = vector.extract_strided_slice %3 {offsets = [8, 0], sizes = [8, 256], strides = [1, 1]} : vector<24x256xf32> to vector<8x256xf32>
    %15 = arith.mulf %0, %14 : vector<8x256xf32>
    %cst_8 = arith.constant dense<0.000000e+00> : vector<256xf32>
    %16 = vector.multi_reduction <add>, %15, %cst_8 [0] : vector<8x256xf32> to vector<256xf32>
    %17 = vector.shape_cast %16 : vector<256xf32> to vector<1x256xf32>
    %c1 = arith.constant 1 : index
    %18 = memref.load %arg4[%c1] : memref<3xf32, #tpu.memory_space<smem>>
    %19 = vector.extract_strided_slice %4 {offsets = [1, 0], sizes = [1, 256], strides = [1, 1]} : vector<3x256xf32> to vector<1x256xf32>
    %20 = vector.broadcast %18 : f32 to vector<1x256xf32>
    %21 = arith.addf %20, %19 : vector<1x256xf32>
    %22 = arith.addf %21, %17 : vector<1x256xf32>
    %23 = vector.extract_strided_slice %3 {offsets = [16, 0], sizes = [8, 256], strides = [1, 1]} : vector<24x256xf32> to vector<8x256xf32>
    %24 = arith.mulf %0, %23 : vector<8x256xf32>
    %cst_9 = arith.constant dense<0.000000e+00> : vector<256xf32>
    %25 = vector.multi_reduction <add>, %24, %cst_9 [0] : vector<8x256xf32> to vector<256xf32>
    %26 = vector.shape_cast %25 : vector<256xf32> to vector<1x256xf32>
    %c2 = arith.constant 2 : index
    %27 = memref.load %arg4[%c2] : memref<3xf32, #tpu.memory_space<smem>>
    %28 = vector.extract_strided_slice %4 {offsets = [2, 0], sizes = [1, 256], strides = [1, 1]} : vector<3x256xf32> to vector<1x256xf32>
    %29 = vector.broadcast %27 : f32 to vector<1x256xf32>
    %30 = arith.addf %29, %28 : vector<1x256xf32>
    %31 = arith.addf %30, %26 : vector<1x256xf32>
    %32 = arith.maximumf %13, %22 : vector<1x256xf32>
    %33 = arith.maximumf %32, %31 : vector<1x256xf32>
    %34 = arith.subf %13, %33 : vector<1x256xf32>
    %35 = math.exp %34 : vector<1x256xf32>
    %36 = arith.subf %22, %33 : vector<1x256xf32>
    %37 = math.exp %36 : vector<1x256xf32>
    %38 = arith.addf %35, %37 : vector<1x256xf32>
    %39 = arith.subf %31, %33 : vector<1x256xf32>
    %40 = math.exp %39 : vector<1x256xf32>
    %41 = arith.addf %38, %40 : vector<1x256xf32>
    %42 = math.log %41 : vector<1x256xf32>
    %43 = arith.addf %33, %42 : vector<1x256xf32>
    %c0_10 = arith.constant 0 : index
    %c0_11 = arith.constant 0 : index
    %44 = vector.load %arg5[%c0_10, %c0_11] : memref<1x256xf32, #tpu.memory_space<vmem>>, vector<1x256xf32>
    tpu.vector_store %arg5[%c0_10, %c0_11], %43 {strides = array<i32>} : memref<1x256xf32, #tpu.memory_space<vmem>>, vector<1x256xf32>,
    return
  }
  func.func @transform_0(%arg0: i32) -> (i32, i32) {
    %c0_i32 = arith.constant 0 : i32
    %c0_i32_0 = arith.constant 0 : i32
    return %c0_i32, %arg0 : i32, i32
  }
  func.func @transform_1(%arg0: i32) -> (i32, i32) {
    %c0_i32 = arith.constant 0 : i32
    %c0_i32_0 = arith.constant 0 : i32
    %c0_i32_1 = arith.constant 0 : i32
    return %c0_i32, %c0_i32_0 : i32, i32
  }
  func.func @transform_2(%arg0: i32) -> (i32, i32) {
    %c0_i32 = arith.constant 0 : i32
    %c0_i32_0 = arith.constant 0 : i32
    %c0_i32_1 = arith.constant 0 : i32
    return %c0_i32, %c0_i32_0 : i32, i32
  }
  func.func @transform_3(%arg0: i32) -> i32 {
    %c0_i32 = arith.constant 0 : i32
    %c0_i32_0 = arith.constant 0 : i32
    return %c0_i32 : i32
  }
  func.func @transform_4(%arg0: i32) -> (i32, i32) {
    %c0_i32 = arith.constant 0 : i32
    %c0_i32_0 = arith.constant 0 : i32
    return %c0_i32, %arg0 : i32, i32
  }
}

</mosaic_0001>

<bundles_post_ra>
// kernel: tpu_custom_call.1
= control target key start
LH: loop header
LB: loop body
LE: loop exit
PB: predicated region body
PF: predicated region fallthrough
CT: control target
= control target key end

     0   :  { %9 = vsyncpa [#allocation4], 0  ;;  %s509_s0 = inlined_call_operand.vmem [shape: f32[8,256], index: 0, kind: input, shape index: {}]   ;;  %s510_s1 = inlined_call_operand.vmem [shape: f32[24,8], index: 1, kind: input, shape index: {}]   ;;  %s511_s2 = inlined_call_operand.vmem [shape: f32[3,8], index: 2, kind: input, shape index: {}]   ;;  %s512_s3 = inlined_call_operand.vmem [shape: f32[3], index: 3, kind: input, shape index: {}]   ;;  %s513_s4 = inlined_call_operand.hbm [shape: f32[1,256], index: 4, kind: output, shape index: {}]  }
   0x1   :  { %10 = vsyncpa [#allocation3], 0  ;;  %s23_s17 = sshll.u32 %s512_s3, 4  ;;  %s24_s17 = int_to_ptr.vmem [resolvable:$true] %s23_s17 }
   0x2   :  { %s396_s18 = scalar_lea.vmem %s24_s17, 16  ;;  %p401_p1 = scmp.lt.s32.totalorder %s24_s17, %s24_s17 }
   0x3   :  { %p397_p0 = scmp.ne.s32.totalorder %s24_s17, %s396_s18  ;;  %p402_p2 = scmp.lt.s32.totalorder %s396_s18, %s396_s18 }
   0x5   :  { %p403_p3 = por %p402_p2, %p401_p1 }
   0x7   :  { %p404_p4 = pnand %p403_p3, %p397_p0 }
   0x9   :  { %407 = shalt.err (!%p404_p4)
}
   0xa   :  { %s434_s19 = smov [#allocation2]  }
   0xb   :  { %26 = dma.vmem_to_smem %s24_s17, 16, %s434_s19, [#allocation4]  }
   0xc   :  { %430 = dma.done.wait [#allocation4], 16  }
   0xd   :  { %431 = vsyncadd [#allocation4], 4294967280 }
   0xe   :  { %30 = sfence }
   0xf   :  { %v32_v0 = vld [vmem:[%s509_s0 + $0x8] sm:$0xff]  ;;  %v31_v1 = vld [vmem:[%s509_s0] sm:$0xff]  ;;  %vm37_vm0 = vcmask 64512   ;;  %v35_v3 = vld [vmem:[%s510_s1 + $0x10] sm:$0xff]  ;;  %v435_v4 = vmov 0.0   ;;  %s488_s30 = sld [smem:[#allocation2]] }
  0x10   :  { %47 = vmatprep.subr.mxu0 %v32_v0  ;;  %374 = vmatprep.subr.mxu1 %v32_v0  ;;  %v33_v2 = vld [vmem:[%s510_s1] sm:$0xff]  ;;  %v34_v5 = vld [vmem:[%s510_s1 + $0x8] sm:$0xff]  ;;  %s490_s5 = sld [smem:[#allocation2 + $0x2]]  ;;  %s492_s6 = sld [smem:[#allocation2 + $0x1]] }
  0x11   :  { %48 = vmatpush1.msra.mxu0 %v31_v1  ;;  %375 = vmatpush1.msra.mxu1 %v31_v1  ;;  %v36_v6 = vld [vmem:[%s511_s2] sm:$0x7]  ;;  %s437_s1 = smov [#allocation5]  }
  0x12   :  { %111 = vmatprep.mubr.f32.mxu0 %v435_v4  ;;  %123 = vmatprep.mubr.f32.mxu1 %v435_v4  ;;  %s359_s2 = sshll.u32 %s437_s1, 4  ;;  %s360_s2 = int_to_ptr.vmem [resolvable:$true] %s359_s2 }
  0x13   :  { %368 = vmatmul.mubr.msk.f32.vlgmr.msra.gmra.mrb[0].mxu0 %vm37_vm0, %v33_v2  ;;  %370 = vmatmul.mubr.msk.f32.vlgmr.msra.gmra.mrb[0].mxu1 %vm37_vm0, %v35_v3  ;;  %s408_s7 = scalar_lea.vmem %s360_s2, 32  ;;  %p413_p6 = scmp.lt.s32.totalorder %s360_s2, %s360_s2 }
  0x14   :  { %117 = vmatprep.mubr.f32.mxu0 %v435_v4  ;;  %133 = vmatprep.subr.mxu1 %v32_v0  ;;  %p409_p5 = scmp.ne.s32.totalorder %s360_s2, %s408_s7  ;;  %p414_p7 = scmp.lt.s32.totalorder %s408_s7, %s408_s7 }
  0x15   :  { %134 = vmatpush1.msra.mxu1 %v31_v1  ;;  %197 = vmatprep.mubr.f32.mxu1 %v435_v4  ;;  %v219_v29 = vstv %s488_s30 }
  0x16   :  { %v259_v33 = vstv %s490_s5  ;;  %v239_v37 = vstv %s492_s6  ;;  %p415_p8 = por %p414_p7, %p413_p6 }
  0x17   :  { %369 = vmatmul.mubr.msk.f32.gmra.mrb[2].mxu0 %vm37_vm0, %v34_v5  ;;  %371 = vmatmul.mubr.msk.f32.vlgmr.msra.gmra.mrb[2].mxu1 %vm37_vm0, %v36_v6 }
  0x18   :  { %p416_p9 = pnand %p415_p8, %p409_p5 }
  0xe6   :  { %v113_v7 = vpop.f32.mrb[0].mxu0  ;;  %v125_v8 = vpop.f32.mrb[0].mxu1 }
  0xe7   :  { %v204_v9 = vmul.f32 %v113_v7, %v31_v1  ;;  %v244_v10 = vmul.f32 %v125_v8, %v31_v1  ;;  %v115_v11 = vpop.f32.mrb[1].mxu0  ;;  %v127_v12 = vpop.f32.mrb[1].mxu1 }
  0xe8   :  { %v205_v13 = vmul.f32 %v115_v11, %v32_v0  ;;  %v245_v14 = vmul.f32 %v127_v12, %v32_v0 }
  0xe9   :  { %v206_v15 = vrot.slane %v204_v9, 4  ;;  %v246_v16 = vrot.slane %v244_v10, 4 }
  0xea   :  { %v212_v17 = vrot.slane %v205_v13, 4  ;;  %v252_v18 = vrot.slane %v245_v14, 4  ;;  %v119_v19 = vpop.f32.mrb[2].mxu0  ;;  %v199_v20 = vpop.f32.mrb[2].mxu1 }
  0xeb   :  { %v207_v21 = vadd.f32 %v206_v15, %v204_v9  ;;  %v247_v22 = vadd.f32 %v246_v16, %v244_v10  ;;  %v224_v23 = vmul.f32 %v119_v19, %v31_v1  ;;  %v121_v24 = vpop.f32.mrb[3].mxu0  ;;  %v201_v25 = vpop.f32.mrb[3].mxu1  ;;  %v220_v41 = vadd.f32 %v219_v29, %v199_v20 }
  0xec   :  { %v213_v26 = vadd.f32 %v212_v17, %v205_v13  ;;  %v253_v27 = vadd.f32 %v252_v18, %v245_v14  ;;  %v225_v28 = vmul.f32 %v121_v24, %v32_v0  ;;  %v221_v45 = vadd.f32 %v219_v29, %v201_v25 }
  0xed   :  { %v208_v30 = vrot.slane %v207_v21, 2  ;;  %v248_v31 = vrot.slane %v247_v22, 2  ;;  %v226_v32 = vrot.slane %v224_v23, 4  ;;  %v260_v49 = vadd.f32 %v259_v33, %v199_v20 }
  0xee   :  { %v214_v34 = vrot.slane %v213_v26, 2  ;;  %v254_v35 = vrot.slane %v253_v27, 2  ;;  %v232_v36 = vrot.slane %v225_v28, 4  ;;  %v261_v53 = vadd.f32 %v259_v33, %v201_v25 }
  0xef   :  { %v209_v38 = vadd.f32 %v208_v30, %v207_v21  ;;  %v249_v39 = vadd.f32 %v248_v31, %v247_v22  ;;  %v227_v40 = vadd.f32 %v226_v32, %v224_v23  ;;  %v240_v62 = vadd.f32 %v239_v37, %v199_v20 }
  0xf0   :  { %v215_v42 = vadd.f32 %v214_v34, %v213_v26  ;;  %v255_v43 = vadd.f32 %v254_v35, %v253_v27  ;;  %v233_v44 = vadd.f32 %v232_v36, %v225_v28  ;;  %v241_v2 = vadd.f32 %v239_v37, %v201_v25 }
  0xf1   :  { %v210_v46 = vrot.slane %v209_v38, 1  ;;  %v250_v47 = vrot.slane %v249_v39, 1  ;;  %v228_v48 = vrot.slane %v227_v40, 2 }
  0xf2   :  { %v216_v50 = vrot.slane %v215_v42, 1  ;;  %v256_v51 = vrot.slane %v255_v43, 1  ;;  %v234_v52 = vrot.slane %v233_v44, 2 }
  0xf3   :  { %v211_v54 = vadd.f32 %v210_v46, %v209_v38  ;;  %v251_v55 = vadd.f32 %v250_v47, %v249_v39  ;;  %v229_v56 = vadd.f32 %v228_v48, %v227_v40  ;;  %v436_v46 = vmov 1966171168  }
  0xf4   :  { %v235_v57 = vadd.f32 %v234_v52, %v233_v44  ;;  %v217_v58 = vadd.f32 %v216_v50, %v215_v42  ;;  %v257_v59 = vadd.f32 %v256_v51, %v255_v43  ;;  %v334_v47 = vunpack.c.l.s4 %v436_v46 }
  0xf5   :  { %v230_v60 = vrot.slane %v229_v56, 1  ;;  %v222_v61 = vadd.f32 %v220_v41, %v211_v54  ;;  %v262_v63 = vadd.f32 %v260_v49, %v251_v55  ;;  %v336_v48 = vlaneseq }
  0xf6   :  { %v236_v0 = vrot.slane %v235_v57, 1  ;;  %v223_v1 = vadd.f32 %v221_v45, %v217_v58  ;;  %v263_v3 = vadd.f32 %v261_v53, %v257_v59  ;;  %v335_v50 = vunpack.c.0.s8 %v334_v47 }
  0xf7   :  { %v231_v4 = vadd.f32 %v230_v60, %v229_v56  ;;  %v274_v11 = vrot.slane %v262_v63, 2  ;;  %v337_v51 = vshrl.u32 %v336_v48, 7  ;;  %vm350_vm1 = vcmp.lt.s32.totalorder %v336_v48, 256 }
  0xf8   :  { %v237_v5 = vadd.f32 %v236_v0, %v235_v57  ;;  %v275_v13 = vrot.slane %v263_v3, 2 }
  0xf9   :  { %v242_v6 = vadd.f32 %v240_v62, %v231_v4  ;;  %v338_v57 = vsub.s32 %v335_v50, %v337_v51 }
  0xfa   :  { %v243_v7 = vadd.f32 %v241_v2, %v237_v5 }
  0xfb   :  { %v266_v8 = vrot.slane %v242_v6, 1 }
  0xfc   :  { %v267_v9 = vrot.slane %v243_v7, 1 }
  0xfd   :  { %v270_v10 = vmax.f32 %v222_v61, %v266_v8 }
  0xfe   :  { %v271_v12 = vmax.f32 %v223_v1, %v267_v9 }
  0xff   :  { %v278_v14 = vmax.f32 %v270_v10, %v274_v11 }
 0x100   :  { %v279_v15 = vmax.f32 %v271_v12, %v275_v13 }
 0x101   :  { %v280_v16 = vsub.f32 %v222_v61, %v278_v14  ;;  %v288_v17 = vrot.slane %v278_v14, 7  ;;  %v306_v18 = vrot.slane %v278_v14, 6 }
 0x102   :  { %v281_v19 = vsub.f32 %v223_v1, %v279_v15  ;;  %v289_v20 = vrot.slane %v279_v15, 7  ;;  %v307_v21 = vrot.slane %v279_v15, 6 }
 0x103   :  { %v282_v22 = vmul.f32 1.442695, %v280_v16  ;;  %v292_v23 = vsub.f32 %v242_v6, %v288_v17  ;;  %v310_v24 = vsub.f32 %v262_v63, %v306_v18 }
 0x104   :  { %v284_v25 = vmul.f32 1.442695, %v281_v19  ;;  %v293_v26 = vsub.f32 %v243_v7, %v289_v20  ;;  %v311_v27 = vsub.f32 %v263_v3, %v307_v21 }
 0x105   :  { %380 = vpow2.f32 %v282_v22  ;;  %v294_v28 = vmul.f32 1.442695, %v292_v23  ;;  %v312_v29 = vmul.f32 1.442695, %v310_v24 }
 0x106   :  { %382 = vpow2.f32 %v284_v25  ;;  %v296_v30 = vmul.f32 1.442695, %v293_v26  ;;  %v314_v31 = vmul.f32 1.442695, %v311_v27 }
 0x107   :  { %384 = vpow2.f32 %v294_v28 }
 0x108   :  { %386 = vpow2.f32 %v296_v30 }
 0x109   :  { %388 = vpow2.f32 %v312_v29 }
 0x10a   :  { %390 = vpow2.f32 %v314_v31 }
 0x10f   :  { %v381_v32 = vpop.eup %380 }
 0x110   :  { %v383_v33 = vpop.eup %382 }
 0x111   :  { %v385_v34 = vpop.eup %384 }
 0x112   :  { %v387_v35 = vpop.eup %386  ;;  %v300_v36 = vrot.slane %v385_v34, 1 }
 0x113   :  { %v389_v37 = vpop.eup %388  ;;  %v301_v38 = vrot.slane %v387_v35, 1 }
 0x114   :  { %v391_v39 = vpop.eup %390  ;;  %v304_v40 = vadd.f32 %v381_v32, %v300_v36  ;;  %v318_v41 = vrot.slane %v389_v37, 2 }
 0x115   :  { %v305_v42 = vadd.f32 %v383_v33, %v301_v38  ;;  %v319_v43 = vrot.slane %v391_v39, 2 }
 0x116   :  { %v322_v44 = vadd.f32 %v318_v41, %v304_v40 }
 0x117   :  { %v323_v45 = vadd.f32 %v319_v43, %v305_v42 }
 0x118   :  { %392 = vlog2.f32 %v322_v44 }
 0x119   :  { %394 = vlog2.f32 %v323_v45 }
 0x122   :  { %v393_v49 = vpop.eup %392 }
 0x123   :  { %v395_v52 = vpop.eup %394  ;;  %v325_v53 = vmul.f32 0.6931472, %v393_v49 }
 0x124   :  { %v327_v54 = vmul.f32 0.6931472, %v395_v52 }
 0x125   :  { %v328_v55 = vadd.f32 %v325_v53, %v278_v14 }
 0x126   :  { %v329_v56 = vadd.f32 %v327_v54, %v279_v15 }
 0x128   :  { %v332_v58 = vcombine.low %v328_v55, %v329_v56 }
 0x12a   :  { %v339_v59 = vrot.slane %v332_v58, %v338_v57 }
 0x12c   :  { %v346_v60 = vrot.slane %v339_v59, %v338_v57 }
 0x12e   :  { %352 = vst.msk [vmem:[#allocation5] sm:$0x3] %vm350_vm1, %v346_v60 }
 0x12f   :  { %419 = shalt.err (!%p416_p9)
}
 0x130   :  { %s420_s10 = scalar_lea.hbm %s513_s4, 32 }
 0x131   :  { %p421_p10 = scmp.ne.s32.totalorder %s513_s4, %s420_s10  ;;  %p424_p11 = scmp.lt.u32.totalorder %s420_s10, %s513_s4 }
 0x133   :  { %p426_p12 = pnand %p424_p11, %p421_p10 }
 0x135   :  { %429 = shalt.err (!%p426_p12)
}
 0x136   :  { %362 = dma.vmem_to_hbm [thread:$0]  %s360_s2, 32, %s513_s4, [#allocation3]  }
 0x137   :  { %432 = dma.done.wait [#allocation3], 32  }
 0x138   :  { %433 = vsyncadd [#allocation3], 4294967264 }
 0x139   :  { %366 = vsyncpa [#allocation3], 1 }
 0x13a   :  { %367 = vsyncpa [#allocation4], 1 }

</bundles_post_ra>
